<compile_context>
chip_gen: v6e
topology: v6e:2x2x1
jax: 0.10.0
libtpu: 0.0.40
codegen_flags: <defaults>
</compile_context>

<pallas_src>
import math

import jax
import jax.numpy as jnp
from jax.experimental import pallas as pl
from jax.experimental.pallas import tpu as pltpu


def _orthogonal_kernel(x_ref, qt_ref, b_ref, o_ref):
    # Hot path: y = x @ Qt + bias.  Qt is already Q^T (pre-transposed in param setup),
    # so there is no in-kernel XLU transpose.  The operand cast rides the VPU under
    # MXU slack instead of being a separate wrapper-side HBM pass.
    x = x_ref[...].astype(qt_ref.dtype)                               # (TM, N)
    y = jnp.dot(x, qt_ref[...], preferred_element_type=jnp.float32)   # MXU, f32 accumulate
    o_ref[...] = (y + b_ref[...]).astype(o_ref.dtype)                 # f32 bias epilogue


def _round_up(v, m):
    return ((v + m - 1) // m) * m


def _choose_tiles(B, N, Np, x_bytes, qt_bytes, out_bytes, *, block_m, vmem_budget):
    """Pick (tm, tn) so that double-buffered tiles fit the VMEM budget."""
    # Row tile: MXU-aligned (multiple of 256) when the batch is big enough, and >=2
    # row tiles whenever B permits so both v7x TensorCores get work.
    if B >= 2 * block_m:
        tm = block_m
    elif B >= 512:
        tm = max(256, (pl.cdiv(B, 2) // 256) * 256)
    elif B > 8:
        tm = max(8, (pl.cdiv(B, 2) // 8) * 8)
    else:
        tm = 8

    def vmem_bytes(tm_, tn_):
        return (2 * tm_ * N * x_bytes          # x tile, double-buffered
                + 2 * N * tn_ * qt_bytes       # Qt panel (x2 in case it is double-buffered)
                + 2 * tn_ * 4                  # bias panel
                + 2 * tm_ * tn_ * out_bytes    # out tile, double-buffered
                + tm_ * tn_ * 4                # f32 matmul result
                + tm_ * N * qt_bytes)          # in-kernel cast of the x tile

    # Column tile of Qt / out: largest lane-dense (multiple of 128) divisor of Np that fits.
    candidates = [Np] + [c for c in (4096, 2048, 1024, 512, 256, 128)
                         if c < Np and Np % c == 0]
    tn = candidates[-1]
    for c in candidates:
        if vmem_bytes(tm, c) <= vmem_budget:
            tn = c
            break
    while vmem_bytes(tm, tn) > vmem_budget and tm > 8:
        tm = max(8, ((tm // 2) // 8) * 8)
    return tm, tn


def orthogonal_forward(x, qt, bias2d, *, block_m=512, vmem_limit_bytes=48 * 1024 * 1024):
    """y = x @ qt + bias, with (qt, bias2d) produced by `prepare_orthogonal_params`.

    qt has shape (N, Np) with Np = N padded up to a multiple of 128 (zero columns);
    the padded columns are sliced off the result.
    """
    B, N = x.shape
    K, Np = qt.shape
    assert K == N, "qt must be (N, N_padded) with first dim matching x's feature dim"
    out_dtype = x.dtype

    x_bytes = jnp.dtype(x.dtype).itemsize
    qt_bytes = jnp.dtype(qt.dtype).itemsize
    out_bytes = jnp.dtype(out_dtype).itemsize
    tm, tn = _choose_tiles(B, N, Np, x_bytes, qt_bytes, out_bytes,
                           block_m=block_m,
                           vmem_budget=int(0.8 * vmem_limit_bytes))

    # (column tiles, row tiles): rows iterate fastest, so each Qt panel is DMA'd from
    # HBM exactly once and x row tiles stream underneath it.
    grid = (Np // tn, pl.cdiv(B, tm))

    cost = pl.CostEstimate(
        flops=2 * B * N * Np,
        transcendentals=0,
        bytes_accessed=(x_bytes * B * N * (Np // tn)
                        + qt_bytes * N * Np
                        + out_bytes * B * Np
                        + 4 * Np),
    )

    out = pl.pallas_call(
        _orthogonal_kernel,
        out_shape=jax.ShapeDtypeStruct((B, Np), out_dtype),
        grid_spec=pltpu.PrefetchScalarGridSpec(
            num_scalar_prefetch=0,
            grid=grid,
            in_specs=[
                pl.BlockSpec((tm, N), lambda j, i: (i, 0)),   # x rows (ragged last tile OK)
                pl.BlockSpec((N, tn), lambda j, i: (0, j)),   # Qt column panel (VMEM-resident per j)
                pl.BlockSpec((1, tn), lambda j, i: (0, j)),   # bias panel
            ],
            out_specs=pl.BlockSpec((tm, tn), lambda j, i: (i, j)),
        ),
        compiler_params=pltpu.CompilerParams(
            dimension_semantics=("parallel", "parallel"),     # independent tiles -> megacore OK
            vmem_limit_bytes=int(vmem_limit_bytes),
        ),
        cost_estimate=cost,
    )(x, qt, bias2d)

    # TODO(synk): in production keep the lane-padded width end-to-end (and/or verify via
    # lower_as_mlir that the constant-index Qt panel is single-buffered; consider
    # pl.Buffered(3) on x/out when profiling shows exposed DMA at small N).
    return out if Np == N else out[:, :N]


def make_orthogonal_params(key, n):
    """Deterministic parameter init mirroring Orthogonal.reset_parameters."""
    k_q, k_b = jax.random.split(key)
    q_params = jax.random.uniform(
        k_q, (n, n), dtype=jnp.float32, minval=-math.pi, maxval=math.pi
    )
    q_params = jnp.triu(q_params, k=1)          # keep strictly upper triangle
    bound = 1.0 / math.sqrt(n)                  # fan_in of an (n, n) weight
    bias = jax.random.uniform(
        k_b, (n,), dtype=jnp.float32, minval=-bound, maxval=bound
    )
    return q_params, bias


def compute_q(q_params):
    """Q = expm(triu(q_params,1) - triu(q_params,1).T)  (parameter setup, not hot path)."""
    triu = jnp.triu(q_params, k=1)
    log_rotation = triu - triu.T
    # TODO(synk): matrix_exp (scaling-and-squaring) stays in plain JAX — one-time
    # parameter setup, not the forward hot path.
    return jax.scipy.linalg.expm(log_rotation)


def prepare_orthogonal_params(q_params, bias, param_dtype=jnp.bfloat16, lane_pad=128):
    """One-time layout work hoisted out of the forward call:
      * Q = expm(skew), pre-transposed so the kernel does x @ Qt (no in-kernel transpose),
      * output columns zero-padded to a multiple of `lane_pad` (lane-dense output stores;
        use 256 to also fill the v6e/v7x 256x256 MXU),
      * bias reshaped to (1, Np), kept f32 (bias add stays f32),
      * Qt cast to bf16 by default (f32 accumulation preserved via preferred_element_type).
    """
    n = q_params.shape[0]
    if bias is None:
        bias = jnp.zeros((n,), dtype=jnp.float32)
    q = compute_q(q_params)
    qt = q.T                                                  # (n, n)
    np_pad = max(lane_pad, _round_up(n, lane_pad))
    if np_pad != n:
        qt = jnp.pad(qt, ((0, 0), (0, np_pad - n)))           # zero output columns
    qt = qt.astype(param_dtype)
    b2d = bias.reshape(1, -1).astype(jnp.float32)
    if np_pad != n:
        b2d = jnp.pad(b2d, ((0, 0), (0, np_pad - n)))
    return qt, b2d


if __name__ == "__main__":
    key = jax.random.PRNGKey(0)
    n = 32
    batch = 8

    k_params, k_x = jax.random.split(key)
    q_params, bias = make_orthogonal_params(k_params, n)
    x = jax.random.normal(k_x, (batch, n), dtype=jnp.float32)

    # Pure-JAX reference of nn.functional.linear(x, Q, bias)
    q = compute_q(q_params)
    y_ref = x @ q.T + bias

    # 1) f32-weight path (exact semantics check)
    qt32, b2d = prepare_orthogonal_params(q_params, bias, param_dtype=jnp.float32)
    y32 = jax.block_until_ready(orthogonal_forward(x, qt32, b2d))
    assert y32.shape == (batch, n)
    assert jnp.allclose(y32, y_ref, atol=1e-4, rtol=1e-4)

    # 2) default bf16-weight path (f32 accumulate; looser tolerance vs f32 reference)
    qt16, b2d16 = prepare_orthogonal_params(q_params, bias)   # bf16 default
    y16 = jax.block_until_ready(orthogonal_forward(x, qt16, b2d16))
    assert y16.shape == (batch, n)
    assert jnp.allclose(y16, y_ref, atol=5e-2, rtol=5e-2)

    print("KERNEL_OK")
</pallas_src>

<mosaic_0001>
module attributes {stable_mosaic.version = 11 : i64} {
  func.func @_orthogonal_kernel(%arg0: i32, %arg1: i32, %arg2: memref<8x32xf32, #tpu.memory_space<vmem>>, %arg3: memref<32x128xf32, #tpu.memory_space<vmem>>, %arg4: memref<1x128xf32, #tpu.memory_space<vmem>>, %arg5: memref<8x128xf32, #tpu.memory_space<vmem>>) attributes {dimension_semantics = [#tpu.dimension_semantics<parallel>, #tpu.dimension_semantics<parallel>], iteration_bounds = array<i64: 1, 1>, scalar_prefetch = 0 : i64, scratch_operands = 0 : i64, tpu.core_type = #tpu.core_type<tc>, window_params = [{transform_indices = @transform_0, window_bounds = array<i64: 8, 32>}, {transform_indices = @transform_1, window_bounds = array<i64: 32, 128>}, {transform_indices = @transform_2, window_bounds = array<i64: 1, 128>}, {transform_indices = @transform_3, window_bounds = array<i64: 8, 128>}]} {
    %c0 = arith.constant 0 : index
    %c0_0 = arith.constant 0 : index
    %0 = vector.load %arg2[%c0, %c0_0] : memref<8x32xf32, #tpu.memory_space<vmem>>, vector<8x32xf32>
    %c0_1 = arith.constant 0 : index
    %c0_2 = arith.constant 0 : index
    %1 = vector.load %arg3[%c0_1, %c0_2] : memref<32x128xf32, #tpu.memory_space<vmem>>, vector<32x128xf32>
    %cst = arith.constant dense<0.000000e+00> : vector<8x128xf32>
    %2 = tpu.matmul %0, %1, %cst {dimension_numbers = #tpu.dot_dimension_numbers<[1], [0], [0], [1], [0, 0, 1, 1], [], []>} : vector<8x32xf32>, vector<32x128xf32>, vector<8x128xf32> -> vector<8x128xf32>
    %c0_3 = arith.constant 0 : index
    %c0_4 = arith.constant 0 : index
    %3 = vector.load %arg4[%c0_3, %c0_4] : memref<1x128xf32, #tpu.memory_space<vmem>>, vector<1x128xf32>
    %4 = vector.broadcast %3 : vector<1x128xf32> to vector<8x128xf32>
    %5 = arith.addf %2, %4 : vector<8x128xf32>
    %c0_5 = arith.constant 0 : index
    %c0_6 = arith.constant 0 : index
    %6 = vector.load %arg5[%c0_5, %c0_6] : memref<8x128xf32, #tpu.memory_space<vmem>>, vector<8x128xf32>
    tpu.vector_store %arg5[%c0_5, %c0_6], %5 {strides = array<i32>} : memref<8x128xf32, #tpu.memory_space<vmem>>, vector<8x128xf32>,
    return
  }
  func.func @transform_0(%arg0: i32, %arg1: i32) -> (i32, i32) {
    %c0_i32 = arith.constant 0 : i32
    %c0_i32_0 = arith.constant 0 : i32
    return %arg1, %c0_i32 : i32, i32
  }
  func.func @transform_1(%arg0: i32, %arg1: i32) -> (i32, i32) {
    %c0_i32 = arith.constant 0 : i32
    %c0_i32_0 = arith.constant 0 : i32
    return %c0_i32, %arg0 : i32, i32
  }
  func.func @transform_2(%arg0: i32, %arg1: i32) -> (i32, i32) {
    %c0_i32 = arith.constant 0 : i32
    %c0_i32_0 = arith.constant 0 : i32
    return %c0_i32, %arg0 : i32, i32
  }
  func.func @transform_3(%arg0: i32, %arg1: i32) -> (i32, i32) {
    %c0_i32 = arith.constant 0 : i32
    return %arg1, %arg0 : i32, i32
  }
}

</mosaic_0001>

<bundles_post_ra>
// kernel: tpu_custom_call.1
= control target key start
LH: loop header
LB: loop body
LE: loop exit
PB: predicated region body
PF: predicated region fallthrough
CT: control target
= control target key end

     0   :  { %8 = vsyncpa [#allocation3], 0  ;;  %s274_s0 = inlined_call_operand.hbm [shape: f32[8,32], index: 0, kind: input, shape index: {}]   ;;  %s275_s1 = inlined_call_operand.hbm [shape: f32[32,128], index: 1, kind: input, shape index: {}]   ;;  %s276_s2 = inlined_call_operand.vmem [shape: f32[1,128], index: 2, kind: input, shape index: {}]   ;;  %s277_s3 = inlined_call_operand.hbm [shape: f32[8,128], index: 3, kind: output, shape index: {}]  }
   0x1   :  { %9 = vsyncpa [#allocation6], 0 }
   0x2   :  { %10 = vsyncpa [#allocation4], 0  ;;  %s235_s12 = smov [#allocation2]   ;;  %s236_s14 = smov [#allocation5]  }
   0x3   :  { %s17_s13 = sshll.u32 %s235_s12, 4  ;;  %s26_s15 = sshll.u32 %s236_s14, 4  ;;  %s18_s13 = int_to_ptr.vmem [resolvable:$true] %s17_s13  ;;  %s27_s15 = int_to_ptr.vmem [resolvable:$true] %s26_s15 }
   0x4   :  { %s177_s16 = scalar_lea.vmem %s18_s13, 128  ;;  %p182_p1 = scmp.lt.s32.totalorder %s18_s13, %s18_s13 }
   0x5   :  { %p178_p0 = scmp.ne.s32.totalorder %s18_s13, %s177_s16  ;;  %p183_p2 = scmp.lt.s32.totalorder %s177_s16, %s177_s16 }
   0x7   :  { %p184_p3 = por %p183_p2, %p182_p1 }
   0x9   :  { %p185_p4 = pnand %p184_p3, %p178_p0 }
   0xb   :  { %188 = shalt.err (!%p185_p4)
}
   0xc   :  { %20 = dma.hbm_to_vmem [thread:$0]  %s274_s0, 128, %s18_s13, [#allocation3]  }
   0xd   :  { %s197_s19 = scalar_lea.vmem %s27_s15, 512  ;;  %p202_p6 = scmp.lt.s32.totalorder %s27_s15, %s27_s15 }
   0xe   :  { %p198_p5 = scmp.ne.s32.totalorder %s27_s15, %s197_s19  ;;  %p203_p7 = scmp.lt.s32.totalorder %s197_s19, %s197_s19 }
  0x10   :  { %p204_p8 = por %p203_p7, %p202_p6 }
  0x12   :  { %p205_p9 = pnand %p204_p8, %p198_p5 }
  0x14   :  { %208 = shalt.err (!%p205_p9)
}
  0x15   :  { %s237_s20 = smov 128   ;;  %s238_s21 = smov 8  }
  0x16   :  { %32 = dma.hbm_to_vmem [thread:$0]  %s275_s1, 512, %s27_s15, [#allocation6], %s237_s20, %s237_s20, %s238_s21  }
  0x17   :  { %229 = dma.done.wait [#allocation3], 128  }
  0x18   :  { %230 = vsyncadd [#allocation3], 4294967168 }
  0x19   :  { %231 = dma.done.wait [#allocation6], 512  }
  0x1a   :  { %232 = vsyncadd [#allocation6], 4294966784  ;;  %v239_v0 = vmov 0.0   ;;  %vm240_vm0 = vmmov 0   ;;  %v45_v1 = vld [vmem:[#allocation5 + $0x18] sm:$0xff]  ;;  %v44_v2 = vld [vmem:[#allocation5 + $0x10] sm:$0xff] }
  0x1b   :  { %151 = vmatprep.subr.mxu0 %v239_v0  ;;  %159 = vmatprep.mubr.msk.f32.mxu0 %vm240_vm0, %v239_v0  ;;  %v43_v3 = vld [vmem:[#allocation5 + $0x8] sm:$0xff]  ;;  %v42_v4 = vld [vmem:[#allocation5] sm:$0xff]  ;;  %v41_v5 = vld [vmem:[#allocation2] sm:$0xff]  ;;  %vm53_vm1 = vcmask 261120   ;;  %s241_s24 = smov [#allocation7]  }
  0x1c   :  { %152 = vmatpush3.msra.mxu0 %v45_v1  ;;  %v144_v6 = vld [vmem:[%s276_s2] ss:$0 sm:$0xff]  ;;  %s134_s25 = sshll.u32 %s241_s24, 4  ;;  %s135_s25 = int_to_ptr.vmem [resolvable:$true] %s134_s25 }
  0x1d   :  { %153 = vmatprep.subr.mxu0 %v239_v0  ;;  %s209_s26 = scalar_lea.vmem %s135_s25, 128  ;;  %p214_p11 = scmp.lt.s32.totalorder %s135_s25, %s135_s25 }
  0x1e   :  { %154 = vmatpush3.msra.mxu0 %v44_v2  ;;  %p210_p10 = scmp.ne.s32.totalorder %s135_s25, %s209_s26  ;;  %p215_p12 = scmp.lt.s32.totalorder %s209_s26, %s209_s26 }
  0x1f   :  { %155 = vmatprep.subr.mxu0 %v239_v0 }
  0x20   :  { %156 = vmatpush3.msra.mxu0 %v43_v3  ;;  %p216_p13 = por %p215_p12, %p214_p11 }
  0x21   :  { %157 = vmatprep.subr.mxu0 %v239_v0 }
  0x22   :  { %158 = vmatpush3.msra.mxu0 %v42_v4  ;;  %p217_p0 = pnand %p216_p13, %p210_p10 }
  0x23   :  { %160 = vmatmul.mubr.msk.f32.vlgmr.msra.gmra.mxu0 %vm53_vm1, %v41_v5 }
  0xe3   :  { %v123_v7 = vpop.f32.mrf.mxu0 }
  0xe4   :  { %v124_v8 = vadd.f32 %v144_v6, %v123_v7 }
  0xe5   :  { %v161_v9 = vpop.f32.mrf.mxu0 }
  0xe6   :  { %127 = vst [vmem:[#allocation7] sm:$0xff] %v124_v8 }
  0xe7   :  { %220 = shalt.err (!%p217_p0)
}
  0xe8   :  { %137 = dma.vmem_to_hbm [thread:$0]  %s135_s25, 128, %s277_s3, [#allocation4]  }
  0xe9   :  { %233 = dma.done.wait [#allocation4], 128  }
  0xea   :  { %234 = vsyncadd [#allocation4], 4294967168 }
  0xeb   :  { %141 = vsyncpa [#allocation3], 1 }
  0xec   :  { %142 = vsyncpa [#allocation6], 1 }
  0xed   :  { %143 = vsyncpa [#allocation4], 1 }

</bundles_post_ra>
